<compile_context>
chip_gen: v7x
topology: tpu7x:2x2x1
jax: 0.10.0
libtpu: 0.0.40
codegen_flags: <defaults>
</compile_context>

<pallas_src>
import jax
import jax.numpy as jnp
from jax.experimental import pallas as pl
from jax.experimental.pallas import tpu as pltpu


def _copy_kernel(x_ref, o_ref):
    # Straight copy of the current lane-dense VMEM tile (vld/vst only; the
    # binding resource is the HBM DMA, so no body-level tuning is needed).
    o_ref[...] = x_ref[...]


def _device_kind() -> str:
    try:
        return jax.devices()[0].device_kind.lower()
    except Exception:
        return ""


def _sublane_packing(dtype) -> int:
    # 8 rows/vreg for 32-bit dtypes, 16 for bf16/f16, 32 for int8/fp8.
    itemsize = jnp.dtype(dtype).itemsize
    return 8 * max(1, 4 // itemsize)


def _to_lane_dense(x: jax.Array):
    """Flatten x to a (rows, C) slab with C a multiple of 128 (lane-dense).

    Returns (x2d, original_size).  If the element count does not factor into a
    wide power-of-two column count, the flat tensor is zero-padded up to a
    multiple of packing*128 so stores still lower to full-width unmasked vst;
    the wrapper slices the padding off afterwards.
    """
    flat = x.reshape(-1)
    total = flat.size
    for c in (8192, 4096, 2048, 1024, 512, 256, 128):
        if total % c == 0:
            return flat.reshape(total // c, c), total
    packing = _sublane_packing(x.dtype)
    quantum = packing * 128
    padded = ((total + quantum - 1) // quantum) * quantum
    flat = jnp.pad(flat, (0, padded - total))
    return flat.reshape(padded // 128, 128), total


def _pallas_copy_2d(x2d: jax.Array) -> jax.Array:
    rows, cols = x2d.shape
    itemsize = x2d.dtype.itemsize
    packing = _sublane_packing(x2d.dtype)

    # Generation-aware limits: v7x has 3.2 TB/s HBM but only 64 MiB VMEM per TC;
    # v5e/v6e have 128 MiB VMEM.  8 MiB blocks amortize the ~0.35 us/step
    # overhead on every generation; 4*block (in+out, double-buffered) stays
    # comfortably under the cap.
    is_v7 = "v7" in _device_kind()
    target_block_bytes = 8 * 1024 * 1024
    vmem_cap = (48 << 20) if is_v7 else (64 << 20)

    row_bytes = cols * itemsize
    rows_per_block = max(
        packing, (target_block_bytes // row_bytes) // packing * packing
    )

    # Guarantee >= 4 grid steps when the tensor is big enough so the input DMA,
    # the VMEM copy, and the output DMA overlap (and both v7x cores get work).
    if rows >= 4 * packing:
        quarter = (rows // 4) // packing * packing
        if quarter >= packing:
            rows_per_block = min(rows_per_block, quarter)

    block_rows = min(rows, rows_per_block)

    # Prefer a block_rows that divides rows (avoid a ragged masked final block).
    if rows % block_rows != 0:
        br = block_rows - (block_rows % packing)
        while br >= packing and rows % br != 0:
            br -= packing
        if br >= packing:
            block_rows = br

    grid = (pl.cdiv(rows, block_rows),)

    block_bytes = block_rows * row_bytes
    # in + out, double-buffered => ~4 * block bytes live, plus headroom.
    vmem_limit = int(min(vmem_cap, max(16 << 20, 4 * block_bytes + (4 << 20))))

    return pl.pallas_call(
        _copy_kernel,
        out_shape=jax.ShapeDtypeStruct((rows, cols), x2d.dtype),
        grid=grid,
        in_specs=[pl.BlockSpec((block_rows, cols), lambda i: (i, 0))],
        out_specs=pl.BlockSpec((block_rows, cols), lambda i: (i, 0)),
        compiler_params=pltpu.CompilerParams(
            dimension_semantics=("parallel",),
            vmem_limit_bytes=vmem_limit,
        ),
        cost_estimate=pl.CostEstimate(
            flops=0,
            transcendentals=0,
            bytes_accessed=2 * rows * cols * itemsize,
        ),
    )(x2d)


def identity_forward(
    x: jax.Array, *, materialize_copy: bool = False, donate_input: bool = False
) -> jax.Array:
    """Identity.forward(x) -> x.

    Default: true zero-cost identity (returns x, no HBM traffic, no kernel).
    materialize_copy=True: run the tuned Pallas copy kernel to produce a fresh,
    un-aliased buffer.  donate_input=True means the caller is happy for the
    result to alias x, so the copy would be pure wasted bandwidth -- we skip the
    kernel entirely and return x.
    """
    if not materialize_copy or x.ndim == 0 or x.size == 0:
        return x
    if donate_input:
        # input_output_aliases={0:0} would make the output HBM buffer BE the
        # input: a full-bandwidth self-copy that changes nothing.  Skip it.
        return x
    x2d, orig_size = _to_lane_dense(x)
    out2d = _pallas_copy_2d(x2d)
    out_flat = out2d.reshape(-1)
    if out_flat.size != orig_size:
        out_flat = out_flat[:orig_size]
    return out_flat.reshape(x.shape)


class Identity:
    """JAX/Pallas mirror of the PyTorch Identity feature module."""

    def __init__(self, input_dim: int):
        self._output_dim = input_dim  # no parameters

    @property
    def output_dim(self):
        return self._output_dim

    def __call__(self, x):
        # forward(x) == x: skip the kernel entirely (zero HBM cost).
        return identity_forward(x)

    def get_optimizer_groups(self, *args, **kwargs):
        return ([], [])


if __name__ == "__main__":
    key = jax.random.PRNGKey(0)
    k0, k1 = jax.random.split(key)

    # Shapes consistent with the module: (batch, input_dim).
    batch, input_dim = 2, 32
    x = jax.random.normal(k0, (batch, input_dim), dtype=jnp.float32)

    # 1) Module forward: true zero-cost identity (returns x, no kernel).
    module = Identity(input_dim)
    out = jax.block_until_ready(module(x))
    assert out.shape == x.shape and out.dtype == x.dtype
    assert bool(jnp.array_equal(out, x))
    assert module.output_dim == input_dim

    # 2) Explicit materialized copy on an awkward shape (64 elems): exercises
    #    the pad-to-lane-dense fallback (no narrow masked-store path).
    out_copy = jax.block_until_ready(identity_forward(x, materialize_copy=True))
    assert out_copy.shape == x.shape and out_copy.dtype == x.dtype
    assert bool(jnp.array_equal(out_copy, x))

    # 3) Explicit materialized copy on a naturally lane-dense shape.
    x2 = jax.random.normal(k1, (16, 256), dtype=jnp.float32)
    out_copy2 = jax.block_until_ready(identity_forward(x2, materialize_copy=True))
    assert out_copy2.shape == x2.shape and out_copy2.dtype == x2.dtype
    assert bool(jnp.array_equal(out_copy2, x2))

    # 4) donate_input short-circuit: no kernel launched, result aliases x.
    out_alias = jax.block_until_ready(
        identity_forward(x, materialize_copy=True, donate_input=True)
    )
    assert bool(jnp.array_equal(out_alias, x))

    print("KERNEL_OK")
</pallas_src>

<mosaic_0001>
module attributes {stable_mosaic.version = 11 : i64} {
  func.func @_copy_kernel(%arg0: i32, %arg1: memref<8x128xf32, #tpu.memory_space<vmem>>, %arg2: memref<8x128xf32, #tpu.memory_space<vmem>>) attributes {dimension_semantics = [#tpu.dimension_semantics<parallel>], iteration_bounds = array<i64: 1>, scalar_prefetch = 0 : i64, scratch_operands = 0 : i64, tpu.core_type = #tpu.core_type<tc>, window_params = [{transform_indices = @transform_0, window_bounds = array<i64: 8, 128>}, {transform_indices = @transform_1, window_bounds = array<i64: 8, 128>}]} {
    %c0 = arith.constant 0 : index
    %c0_0 = arith.constant 0 : index
    %0 = vector.load %arg1[%c0, %c0_0] : memref<8x128xf32, #tpu.memory_space<vmem>>, vector<8x128xf32>
    %c0_1 = arith.constant 0 : index
    %c0_2 = arith.constant 0 : index
    %1 = vector.load %arg2[%c0_1, %c0_2] : memref<8x128xf32, #tpu.memory_space<vmem>>, vector<8x128xf32>
    tpu.vector_store %arg2[%c0_1, %c0_2], %0 {strides = array<i32>} : memref<8x128xf32, #tpu.memory_space<vmem>>, vector<8x128xf32>,
    return
  }
  func.func @transform_0(%arg0: i32) -> (i32, i32) {
    %c0_i32 = arith.constant 0 : i32
    %c0_i32_0 = arith.constant 0 : i32
    return %arg0, %c0_i32 : i32, i32
  }
  func.func @transform_1(%arg0: i32) -> (i32, i32) {
    %c0_i32 = arith.constant 0 : i32
    %c0_i32_0 = arith.constant 0 : i32
    return %arg0, %c0_i32 : i32, i32
  }
}

</mosaic_0001>

<bundles_post_ra>
// kernel: tpu_custom_call.1
= control target key start
LH: loop header
LB: loop body
LE: loop exit
PB: predicated region body
PF: predicated region fallthrough
CT: control target
= control target key end

     0   :  { %6 = vsyncpa [#allocation3], 0  ;;  %s124_s0 = inlined_call_operand.hbm [shape: f32[8,128], index: 0, kind: input, shape index: {}]   ;;  %s125_s1 = inlined_call_operand.hbm [shape: f32[8,128], index: 1, kind: output, shape index: {}]  }
   0x1   :  { %7 = vsyncpa [#allocation4], 0  ;;  %s88_s6 = smov [#allocation2]   ;;  %s40_s10 = scalar_lea.hbm %s124_s0, 128 }
   0x2   :  { %s14_s7 = sshll.u32 %s88_s6, 4  ;;  %p41_p0 = scmp.ne.s32.totalorder %s124_s0, %s40_s10  ;;  %s15_s7 = int_to_ptr.vmem [resolvable:$true] %s14_s7 }
   0x3   :  { %p44_p1 = scmp.lt.u32.totalorder %s40_s10, %s124_s0 }
   0x5   :  { %p46_p2 = pnand %p44_p1, %p41_p0 }
   0x7   :  { %49 = shalt.err (!%p46_p2)
}
   0x8   :  { %s50_s15 = scalar_lea.vmem %s15_s7, 128  ;;  %p55_p4 = scmp.lt.s32.totalorder %s15_s7, %s15_s7 }
   0x9   :  { %p51_p3 = scmp.ne.s32.totalorder %s15_s7, %s50_s15  ;;  %p56_p5 = scmp.lt.s32.totalorder %s50_s15, %s50_s15 }
   0xb   :  { %p57_p6 = por %p56_p5, %p55_p4 }
   0xd   :  { %p58_p7 = pnand %p57_p6, %p51_p3 }
   0xf   :  { %61 = shalt.err (!%p58_p7)
}
  0x10   :  { %17 = dma.hbm_to_vmem [thread:$0]  %s124_s0, 128, %s15_s7, [#allocation3]  }
  0x11   :  { %84 = dma.done.wait [#allocation3], 128  }
  0x12   :  { %85 = vsyncadd [#allocation3], 4294967168  ;;  %s89_s18 = smov [#allocation5]   ;;  %v21_v0 = vld [vmem:[#allocation2] sm:$0xff] }
  0x13   :  { %s29_s19 = sshll.u32 %s89_s18, 4  ;;  %22 = vst [vmem:[#allocation5] sm:$0xff] %v21_v0  ;;  %s30_s19 = int_to_ptr.vmem [resolvable:$true] %s29_s19 }
  0x14   :  { %s62_s20 = scalar_lea.vmem %s30_s19, 128  ;;  %p67_p9 = scmp.lt.s32.totalorder %s30_s19, %s30_s19 }
  0x15   :  { %p63_p8 = scmp.ne.s32.totalorder %s30_s19, %s62_s20  ;;  %p68_p10 = scmp.lt.s32.totalorder %s62_s20, %s62_s20 }
  0x17   :  { %p69_p11 = por %p68_p10, %p67_p9 }
  0x19   :  { %p70_p12 = pnand %p69_p11, %p63_p8 }
  0x1b   :  { %73 = shalt.err (!%p70_p12)
}
  0x1c   :  { %s74_s23 = scalar_lea.hbm %s125_s1, 128 }
  0x1d   :  { %p75_p13 = scmp.ne.s32.totalorder %s125_s1, %s74_s23  ;;  %p78_p0 = scmp.lt.u32.totalorder %s74_s23, %s125_s1 }
  0x1f   :  { %p80_p1 = pnand %p78_p0, %p75_p13 }
  0x21   :  { %83 = shalt.err (!%p80_p1)
}
  0x22   :  { %32 = dma.vmem_to_hbm [thread:$0]  %s30_s19, 128, %s125_s1, [#allocation4]  }
  0x23   :  { %86 = dma.done.wait [#allocation4], 128  }
  0x24   :  { %87 = vsyncadd [#allocation4], 4294967168 }
  0x25   :  { %36 = vsyncpa [#allocation3], 1 }
  0x26   :  { %37 = vsyncpa [#allocation4], 1 }

</bundles_post_ra>
